<compile_context>
chip_gen: v7x
topology: tpu7x:2x2x1
jax: 0.10.0
libtpu: 0.0.40
codegen_flags: <defaults>
</compile_context>

<pallas_src>
import functools
import math

import jax
import jax.numpy as jnp
from jax import lax
from jax.experimental import pallas as pl
from jax.experimental.pallas import tpu as pltpu


def _f2g_kernel(x_ref, prefea_t_ref, weight_t_ref,
                gnode_ref, colsum_ref, logit_ref,
                *, nodes, nodes_pad):
    # x_ref:        (C, t_hw)            channel-major pixel tile (caller dtype)
    # prefea_t_ref: (nodes_pad, C)       pre_fea^T, zero-padded rows, mxu dtype
    # weight_t_ref: (hidden, C)          weight^T, mxu dtype
    # gnode_ref:    (hidden, nodes_pad)  f32 accumulator: sum_hw wnode p^T
    # colsum_ref:   (nodes_pad, 1)       f32 accumulator: sum_hw softmax probs
    # logit_ref:    (nodes, t_hw)        raw node logits, channel-major
    t = pl.program_id(2)

    @pl.when(t == 0)
    def _init():
        gnode_ref[...] = jnp.zeros_like(gnode_ref)
        colsum_ref[...] = jnp.zeros_like(colsum_ref)

    # MXU operands in the feed dtype (bf16 by default), f32 accumulation.
    # Cast happens in VMEM, so no extra HBM traffic is added.
    x = x_ref[...].astype(prefea_t_ref.dtype)            # (C, t_hw)

    # Two separate projections: each result is materialised exactly once (no
    # fused-concat output that then needs sliced VMEM copies).
    # NOTE: with tiny C (e.g. C=4 in the unit test) the MXU runs mostly empty
    # per push; accepted knowingly -- the production path has C >= 128.
    fea = jnp.dot(prefea_t_ref[...], x,
                  preferred_element_type=jnp.float32)     # (nodes_pad, t_hw)
    wnode = jnp.dot(weight_t_ref[...], x,
                    preferred_element_type=jnp.float32)   # (hidden, t_hw)

    # Lane-dense (HW on the lane axis) raw-logit store.
    if nodes_pad == nodes:
        logit_ref[...] = fea.astype(logit_ref.dtype)
        fea_m = fea
    else:
        logit_ref[...] = fea[:nodes].astype(logit_ref.dtype)
        # Kill the zero pad rows so they vanish from the softmax.
        row = lax.broadcasted_iota(jnp.int32, fea.shape, 0)
        fea_m = jnp.where(row < nodes, fea, -1e30)

    # Softmax over the node (sublane) axis; f32 math (no bf16 VPU/EUP on v5e).
    m = jnp.max(fea_m, axis=0, keepdims=True)             # (1, t_hw)
    e = jnp.exp(fea_m - m)
    p = e * pl.reciprocal(jnp.sum(e, axis=0, keepdims=True), approx=True)

    # Running column sums of the softmax probabilities (pad rows contribute 0).
    colsum_ref[...] += jnp.sum(p, axis=1, keepdims=True)  # (nodes_pad, 1)

    # p @ wnode^T accumulated in transposed (hidden, nodes_pad) layout: the NT
    # matmul's transposed operand is the tiny 8-sublane p block, never the
    # (hidden, t_hw) wnode slab.  Kept in f32 -- this matmul is ~C/nodes times
    # smaller than the projections, so bf16 buys nothing and f32 keeps the
    # accumulation exact.
    gnode_ref[...] += lax.dot_general(
        wnode, p, (((1,), (1,)), ((), ())),
        preferred_element_type=jnp.float32)               # (hidden, nodes_pad)


def _tpu_vmem_capacity_bytes():
    try:
        info = pltpu.get_tpu_info()
        for attr in ("vmem_capacity_bytes", "vmem_size_bytes", "vmem_bytes"):
            v = getattr(info, attr, None)
            if v:
                return int(v)
    except Exception:
        pass
    return 64 * 1024 * 1024   # conservative: v7x physical VMEM per TensorCore


def _plan(hw, c, nodes, nodes_pad, hidden, x_bytes, logit_bytes, mxu_bytes,
          tile_hw):
    """Generation-aware tile / VMEM-limit planning (includes intermediates)."""
    vmem = _tpu_vmem_capacity_bytes()
    # Live VMEM bytes per HW column: double-buffered streamed blocks plus the
    # in-kernel compute intermediates (bf16 cast of x, fea/wnode f32 results,
    # softmax temps, the sliced logit store, the transposed-p staging).
    per_col = (2 * c * x_bytes                 # x tile (double-buffered)
               + 3 * nodes * logit_bytes       # logit tile (x2) + slice copy
               + c * mxu_bytes                 # mxu-dtype copy of the x tile
               + (nodes_pad + hidden) * 4      # fea + wnode f32 results
               + 4 * nodes_pad * 4)            # mask / exp / p / p^T temps

    if tile_hw is None:
        if hw % 128 != 0:
            tile_hw = hw                       # full-extent block is always legal
        else:
            # Smaller-VMEM parts (v7x: 64 MiB) get a smaller streaming budget
            # and tile cap; >=512-1024 lanes already reaches ~85%+ of the HBM
            # roofline, so giant tiles buy little.
            budget = min(vmem // 12, 8 * 1024 * 1024)
            cap = 1024 if vmem <= 64 * 1024 * 1024 else 2048
            t = max(128, min(cap, (budget // per_col) // 128 * 128))
            t = min(t, hw)
            while hw % t != 0:
                t -= 128
            tile_hw = t

    fixed = ((nodes_pad + hidden) * c * mxu_bytes     # resident weights
             + 2 * (hidden + 1) * nodes_pad * 4)      # gnode + colsum blocks
    need = per_col * tile_hw + fixed
    limit = int(min(max(2 * need, 16 * 1024 * 1024),
                    min(vmem // 2, 64 * 1024 * 1024)))
    return tile_hw, limit


def featuremaps_to_graph(x, pre_fea, weight, *, tile_hw=None, hw_splits=None,
                         mxu_dtype=jnp.bfloat16, logit_dtype=None):
    """x: (n, c, h, w) or (n, c, d, h, w).
    Returns (graph_node (n, nodes, hidden) f32, fea_logit (n, nodes, *spatial)).

    mxu_dtype:   dtype the matmul operands are fed to the MXU in (bf16 default,
                 f32 accumulation).  Pass jnp.float32 for bit-closer numerics.
    logit_dtype: fea_logit output dtype (defaults to x.dtype; bf16 halves the
                 second-largest HBM stream on bandwidth-bound v5e/v6e).
    """
    assert x.ndim in (4, 5)
    n, c = x.shape[0], x.shape[1]
    spatial = x.shape[2:]
    hw = math.prod(spatial)
    c_pre, nodes = pre_fea.shape
    c_w, hidden = weight.shape
    assert c == c_pre == c_w

    mxu_dtype = jnp.dtype(mxu_dtype)
    logit_dtype = jnp.dtype(logit_dtype if logit_dtype is not None else x.dtype)
    x_bytes = jnp.dtype(x.dtype).itemsize

    # Channel-major input: a pure reshape of NCHW / NCDHW (no transpose).
    x_cmaj = x.reshape(n, c, hw)

    # pre_fea^T zero-padded to a sublane multiple of rows.  The pad rows fall
    # out of the softmax (masked in-kernel) and cost nothing on the MXU.
    nodes_pad = ((nodes + 7) // 8) * 8
    prefea_t = jnp.concatenate(
        [pre_fea.T, jnp.zeros((nodes_pad - nodes, c), pre_fea.dtype)],
        axis=0).astype(mxu_dtype)                        # (nodes_pad, c)
    weight_t = weight.T.astype(mxu_dtype)                # (hidden, c)

    tile_hw, vmem_limit = _plan(hw, c, nodes, nodes_pad, hidden, x_bytes,
                                logit_dtype.itemsize, mxu_dtype.itemsize,
                                tile_hw)
    assert hw % tile_hw == 0
    assert tile_hw == hw or tile_hw % 128 == 0
    n_tiles = hw // tile_hw

    # Optional second "parallel" grid axis over HW halves: keeps both v7x
    # TensorCores busy at batch==1 (harmless on single-TC v5e/v6e); per-half
    # partials are summed in the tiny epilogue below.
    if hw_splits is None:
        hw_splits = 2 if (n == 1 and n_tiles % 2 == 0) else 1
    assert n_tiles % hw_splits == 0
    tiles_per_split = n_tiles // hw_splits
    nsplit = n * hw_splits

    kernel = functools.partial(_f2g_kernel, nodes=nodes, nodes_pad=nodes_pad)

    flops = (2 * n * hw * c * (nodes_pad + hidden)
             + 2 * n * hw * nodes_pad * hidden)
    bytes_accessed = (n * c * hw * x_bytes
                      + n * nodes * hw * logit_dtype.itemsize
                      + (nodes_pad + hidden) * c * mxu_dtype.itemsize
                      + nsplit * (hidden + 1) * nodes_pad * 4)

    grid = (n, hw_splits, tiles_per_split)

    gnode_parts, colsum_parts, fea_cmaj = pl.pallas_call(
        kernel,
        grid_spec=pltpu.PrefetchScalarGridSpec(
            num_scalar_prefetch=0,
            grid=grid,
            in_specs=[
                pl.BlockSpec((None, c, tile_hw),
                             lambda b, s, t: (b, 0, s * tiles_per_split + t)),
                pl.BlockSpec((nodes_pad, c), lambda b, s, t: (0, 0)),
                pl.BlockSpec((hidden, c), lambda b, s, t: (0, 0)),
            ],
            out_specs=[
                pl.BlockSpec((None, hidden, nodes_pad),
                             lambda b, s, t: (b * hw_splits + s, 0, 0)),
                pl.BlockSpec((None, nodes_pad, 1),
                             lambda b, s, t: (b * hw_splits + s, 0, 0)),
                pl.BlockSpec((None, nodes, tile_hw),
                             lambda b, s, t: (b, 0, s * tiles_per_split + t)),
            ],
        ),
        out_shape=(
            jax.ShapeDtypeStruct((nsplit, hidden, nodes_pad), jnp.float32),
            jax.ShapeDtypeStruct((nsplit, nodes_pad, 1), jnp.float32),
            jax.ShapeDtypeStruct((n, nodes, hw), logit_dtype),
        ),
        compiler_params=pltpu.CompilerParams(
            dimension_semantics=("parallel", "parallel", "arbitrary"),
            vmem_limit_bytes=vmem_limit,
        ),
        cost_estimate=pl.CostEstimate(
            flops=flops,
            transcendentals=n * hw * nodes_pad,
            bytes_accessed=bytes_accessed,
        ),
    )(x_cmaj, prefea_t, weight_t)

    # Tiny f32 epilogue on (n, nodes, hidden)-sized tensors: sum HW-split
    # partials, undo the transposed accumulator layout, drop pad node columns,
    # and apply the EXACT column-sum normalisation + relu.  relu commutes with
    # the strictly-positive per-node scale and the scale commutes with the
    # tile/split sums, so this matches the module exactly.
    gnode_acc = gnode_parts.reshape(n, hw_splits, hidden, nodes_pad).sum(axis=1)
    colsum = colsum_parts.reshape(n, hw_splits, nodes_pad, 1).sum(axis=1)
    graph_node = jnp.maximum(
        jnp.transpose(gnode_acc, (0, 2, 1))[:, :nodes, :]
        / colsum[:, :nodes, :], 0.0)

    # Free reshape (no transpose): (n, nodes, hw) -> (n, nodes, *spatial).
    fea_logit = fea_cmaj.reshape(n, nodes, *spatial)
    return graph_node, fea_logit


def _xavier_uniform(key, shape):
    fan_in, fan_out = shape
    bound = math.sqrt(6.0 / (fan_in + fan_out))
    return jax.random.uniform(key, shape, jnp.float32, -bound, bound)


def _reference(x_nchw, pre_fea, weight):
    n, c = x_nchw.shape[:2]
    hw = math.prod(x_nchw.shape[2:])
    input1 = jnp.transpose(x_nchw.reshape(n, c, hw), (0, 2, 1))
    fea_node = jnp.matmul(input1, pre_fea)
    fea_logit = jnp.transpose(fea_node, (0, 2, 1)).reshape(
        n, pre_fea.shape[1], *x_nchw.shape[2:])
    weight_node = jnp.matmul(input1, weight)
    p = jax.nn.softmax(fea_node, axis=-1)
    p = p / jnp.sum(p, axis=1, keepdims=True)
    graph_node = jax.nn.relu(jnp.matmul(jnp.transpose(p, (0, 2, 1)),
                                        weight_node))
    return graph_node, fea_logit


if __name__ == "__main__":
    key = jax.random.PRNGKey(0)
    k_x, k_pre, k_w = jax.random.split(key, 3)

    batch, channels, height, width = 2, 4, 16, 16
    nodes, hidden = 7, 32

    x = jax.random.normal(k_x, (batch, channels, height, width), jnp.float32)
    pre_fea = _xavier_uniform(k_pre, (channels, nodes))
    weight = _xavier_uniform(k_w, (channels, hidden))

    ref_gn, ref_fl = _reference(x, pre_fea, weight)

    # 1) f32 MXU path with HW split into 2 "parallel" halves: grid (2, 2, 1).
    #    Exercises the split-partial epilogue; only remaining numerics slack is
    #    the approx softmax reciprocal (the finalize normalisation is exact).
    gn32, fl32 = featuremaps_to_graph(x, pre_fea, weight, tile_hw=128,
                                      hw_splits=2, mxu_dtype=jnp.float32)
    jax.block_until_ready(gn32)
    jax.block_until_ready(fl32)
    assert jnp.allclose(fl32, ref_fl, atol=1e-4, rtol=1e-4)
    assert jnp.allclose(gn32, ref_gn, atol=5e-3, rtol=5e-3)

    # 2) Default bf16 MXU-operand path (f32 accumulation), multi-tile HW
    #    accumulation: grid (2, 1, 2).  Looser tolerance: bf16 operand rounding.
    gn_bf, fl_bf = featuremaps_to_graph(x, pre_fea, weight, tile_hw=128)
    jax.block_until_ready(gn_bf)
    jax.block_until_ready(fl_bf)
    assert jnp.allclose(fl_bf, ref_fl, atol=5e-2, rtol=5e-2)
    assert jnp.allclose(gn_bf, ref_gn, atol=5e-2, rtol=5e-2)

    print("KERNEL_OK")
</pallas_src>

<mosaic_0001>
module attributes {stable_mosaic.version = 11 : i64} {
  func.func @_f2g_kernel(%arg0: i32, %arg1: i32, %arg2: i32, %arg3: memref<1x4x128xf32, #tpu.memory_space<vmem>>, %arg4: memref<8x4xf32, #tpu.memory_space<vmem>>, %arg5: memref<32x4xf32, #tpu.memory_space<vmem>>, %arg6: memref<1x32x8xf32, #tpu.memory_space<vmem>>, %arg7: memref<1x8x1xf32, #tpu.memory_space<vmem>>, %arg8: memref<1x7x128xf32, #tpu.memory_space<vmem>>) attributes {dimension_semantics = [#tpu.dimension_semantics<parallel>, #tpu.dimension_semantics<parallel>, #tpu.dimension_semantics<arbitrary>], iteration_bounds = array<i64: 2, 2, 1>, scalar_prefetch = 0 : i64, scratch_operands = 0 : i64, tpu.core_type = #tpu.core_type<tc>, window_params = [{transform_indices = @transform_0, window_bounds = array<i64: 1, 4, 128>}, {pipeline_mode = #tpu.pipeline_mode<synchronous>, transform_indices = @transform_1, window_bounds = array<i64: 8, 4>}, {pipeline_mode = #tpu.pipeline_mode<synchronous>, transform_indices = @transform_2, window_bounds = array<i64: 32, 4>}, {transform_indices = @transform_3, window_bounds = array<i64: 1, 32, 8>}, {transform_indices = @transform_4, window_bounds = array<i64: 1, 8, 1>}, {transform_indices = @transform_5, window_bounds = array<i64: 1, 7, 128>}]} {
    %c0_i32 = arith.constant 0 : i32
    %0 = arith.cmpi eq, %arg2, %c0_i32 : i32
    %1 = arith.extui %0 : i1 to i32
    %c0_i32_0 = arith.constant 0 : i32
    %2 = arith.cmpi ne, %1, %c0_i32_0 : i32
    scf.if %2 {
      %cst_28 = arith.constant 0.000000e+00 : f32
      %43 = vector.broadcast %cst_28 : f32 to vector<32x8xf32>
      %c0_29 = arith.constant 0 : index
      %c0_30 = arith.constant 0 : index
      %c0_31 = arith.constant 0 : index
      %44 = vector.load %arg6[%c0_29, %c0_30, %c0_31] : memref<1x32x8xf32, #tpu.memory_space<vmem>>, vector<1x32x8xf32>
      %45 = vector.shape_cast %44 : vector<1x32x8xf32> to vector<32x8xf32>
      %46 = vector.shape_cast %43 : vector<32x8xf32> to vector<1x32x8xf32>
      tpu.vector_store %arg6[%c0_29, %c0_30, %c0_31], %46 {strides = array<i32>} : memref<1x32x8xf32, #tpu.memory_space<vmem>>, vector<1x32x8xf32>,
      %cst_32 = arith.constant 0.000000e+00 : f32
      %47 = vector.broadcast %cst_32 : f32 to vector<8x1xf32>
      %c0_33 = arith.constant 0 : index
      %c0_34 = arith.constant 0 : index
      %c0_35 = arith.constant 0 : index
      %48 = vector.load %arg7[%c0_33, %c0_34, %c0_35] : memref<1x8x1xf32, #tpu.memory_space<vmem>>, vector<1x8x1xf32>
      %49 = vector.shape_cast %48 : vector<1x8x1xf32> to vector<8x1xf32>
      %50 = vector.shape_cast %47 : vector<8x1xf32> to vector<1x8x1xf32>
      tpu.vector_store %arg7[%c0_33, %c0_34, %c0_35], %50 {strides = array<i32>} : memref<1x8x1xf32, #tpu.memory_space<vmem>>, vector<1x8x1xf32>,
    } else {
    }
    %c0 = arith.constant 0 : index
    %c0_1 = arith.constant 0 : index
    %c0_2 = arith.constant 0 : index
    %3 = vector.load %arg3[%c0, %c0_1, %c0_2] : memref<1x4x128xf32, #tpu.memory_space<vmem>>, vector<1x4x128xf32>
    %4 = vector.shape_cast %3 : vector<1x4x128xf32> to vector<4x128xf32>
    %c0_3 = arith.constant 0 : index
    %c0_4 = arith.constant 0 : index
    %5 = vector.load %arg4[%c0_3, %c0_4] : memref<8x4xf32, #tpu.memory_space<vmem>>, vector<8x4xf32>
    %cst = arith.constant dense<0.000000e+00> : vector<8x128xf32>
    %6 = tpu.matmul %5, %4, %cst {dimension_numbers = #tpu.dot_dimension_numbers<[1], [0], [0], [1], [0, 0, 1, 1], [], []>} : vector<8x4xf32>, vector<4x128xf32>, vector<8x128xf32> -> vector<8x128xf32>
    %c0_5 = arith.constant 0 : index
    %c0_6 = arith.constant 0 : index
    %7 = vector.load %arg5[%c0_5, %c0_6] : memref<32x4xf32, #tpu.memory_space<vmem>>, vector<32x4xf32>
    %cst_7 = arith.constant dense<0.000000e+00> : vector<32x128xf32>
    %8 = tpu.matmul %7, %4, %cst_7 {dimension_numbers = #tpu.dot_dimension_numbers<[1], [0], [0], [1], [0, 0, 1, 1], [], []>} : vector<32x4xf32>, vector<4x128xf32>, vector<32x128xf32> -> vector<32x128xf32>
    %9 = vector.extract_strided_slice %6 {offsets = [0, 0], sizes = [7, 128], strides = [1, 1]} : vector<8x128xf32> to vector<7x128xf32>
    %c0_8 = arith.constant 0 : index
    %c0_9 = arith.constant 0 : index
    %c0_10 = arith.constant 0 : index
    %10 = vector.load %arg8[%c0_8, %c0_9, %c0_10] : memref<1x7x128xf32, #tpu.memory_space<vmem>>, vector<1x7x128xf32>
    %11 = vector.shape_cast %10 : vector<1x7x128xf32> to vector<7x128xf32>
    %12 = vector.shape_cast %9 : vector<7x128xf32> to vector<1x7x128xf32>
    tpu.vector_store %arg8[%c0_8, %c0_9, %c0_10], %12 {strides = array<i32>} : memref<1x7x128xf32, #tpu.memory_space<vmem>>, vector<1x7x128xf32>,
    %13 = tpu.iota {dimensions = array<i32: 0>} : vector<8x128xi32>
    %c7_i32 = arith.constant 7 : i32
    %14 = vector.broadcast %c7_i32 : i32 to vector<8x128xi32>
    %15 = arith.cmpi slt, %13, %14 : vector<8x128xi32>
    %cst_11 = arith.constant -1.000000e+30 : f32
    %16 = vector.broadcast %cst_11 : f32 to vector<8x128xf32>
    %17 = arith.select %15, %6, %16 : vector<8x128xi1>, vector<8x128xf32>
    %cst_12 = arith.constant dense<0xFF800000> : vector<128xf32>
    %18 = vector.multi_reduction <maximumf>, %17, %cst_12 [0] : vector<8x128xf32> to vector<128xf32>
    %19 = vector.shape_cast %18 : vector<128xf32> to vector<1x128xf32>
    %20 = vector.broadcast %19 : vector<1x128xf32> to vector<8x128xf32>
    %21 = arith.subf %17, %20 : vector<8x128xf32>
    %22 = math.exp %21 : vector<8x128xf32>
    %cst_13 = arith.constant dense<0.000000e+00> : vector<128xf32>
    %23 = vector.multi_reduction <add>, %22, %cst_13 [0] : vector<8x128xf32> to vector<128xf32>
    %24 = vector.shape_cast %23 : vector<128xf32> to vector<1x128xf32>
    %25 = tpu.reciprocal %24 {approx = true} : vector<1x128xf32> -> vector<1x128xf32>
    %26 = vector.broadcast %25 : vector<1x128xf32> to vector<8x128xf32>
    %27 = arith.mulf %22, %26 : vector<8x128xf32>
    %c0_14 = arith.constant 0 : index
    %c0_15 = arith.constant 0 : index
    %c0_16 = arith.constant 0 : index
    %28 = vector.load %arg7[%c0_14, %c0_15, %c0_16] : memref<1x8x1xf32, #tpu.memory_space<vmem>>, vector<1x8x1xf32>
    %29 = vector.shape_cast %28 : vector<1x8x1xf32> to vector<8x1xf32>
    %cst_17 = arith.constant dense<0.000000e+00> : vector<8xf32>
    %30 = vector.multi_reduction <add>, %27, %cst_17 [1] : vector<8x128xf32> to vector<8xf32>
    %31 = vector.shape_cast %30 : vector<8xf32> to vector<8x1xf32>
    %32 = arith.addf %29, %31 : vector<8x1xf32>
    %c0_18 = arith.constant 0 : index
    %c0_19 = arith.constant 0 : index
    %c0_20 = arith.constant 0 : index
    %33 = vector.load %arg7[%c0_18, %c0_19, %c0_20] : memref<1x8x1xf32, #tpu.memory_space<vmem>>, vector<1x8x1xf32>
    %34 = vector.shape_cast %33 : vector<1x8x1xf32> to vector<8x1xf32>
    %35 = vector.shape_cast %32 : vector<8x1xf32> to vector<1x8x1xf32>
    tpu.vector_store %arg7[%c0_18, %c0_19, %c0_20], %35 {strides = array<i32>} : memref<1x8x1xf32, #tpu.memory_space<vmem>>, vector<1x8x1xf32>,
    %c0_21 = arith.constant 0 : index
    %c0_22 = arith.constant 0 : index
    %c0_23 = arith.constant 0 : index
    %36 = vector.load %arg6[%c0_21, %c0_22, %c0_23] : memref<1x32x8xf32, #tpu.memory_space<vmem>>, vector<1x32x8xf32>
    %37 = vector.shape_cast %36 : vector<1x32x8xf32> to vector<32x8xf32>
    %cst_24 = arith.constant dense<0.000000e+00> : vector<32x8xf32>
    %38 = tpu.matmul %8, %27, %cst_24 {dimension_numbers = #tpu.dot_dimension_numbers<[1], [1], [0], [0], [0, 0, 1, 0], [], []>} : vector<32x128xf32>, vector<8x128xf32>, vector<32x8xf32> -> vector<32x8xf32>
    %39 = arith.addf %37, %38 : vector<32x8xf32>
    %c0_25 = arith.constant 0 : index
    %c0_26 = arith.constant 0 : index
    %c0_27 = arith.constant 0 : index
    %40 = vector.load %arg6[%c0_25, %c0_26, %c0_27] : memref<1x32x8xf32, #tpu.memory_space<vmem>>, vector<1x32x8xf32>
    %41 = vector.shape_cast %40 : vector<1x32x8xf32> to vector<32x8xf32>
    %42 = vector.shape_cast %39 : vector<32x8xf32> to vector<1x32x8xf32>
    tpu.vector_store %arg6[%c0_25, %c0_26, %c0_27], %42 {strides = array<i32>} : memref<1x32x8xf32, #tpu.memory_space<vmem>>, vector<1x32x8xf32>,
    return
  }
  func.func @transform_0(%arg0: i32, %arg1: i32, %arg2: i32) -> (i32, i32, i32) {
    %c1_i32 = arith.constant 1 : i32
    %0 = arith.muli %arg1, %c1_i32 : i32
    %1 = arith.addi %0, %arg2 : i32
    %c0_i32 = arith.constant 0 : i32
    %c0_i32_0 = arith.constant 0 : i32
    return %arg0, %c0_i32, %1 : i32, i32, i32
  }
  func.func @transform_1(%arg0: i32, %arg1: i32, %arg2: i32) -> (i32, i32) {
    %c0_i32 = arith.constant 0 : i32
    %c0_i32_0 = arith.constant 0 : i32
    %c0_i32_1 = arith.constant 0 : i32
    return %c0_i32, %c0_i32_0 : i32, i32
  }
  func.func @transform_2(%arg0: i32, %arg1: i32, %arg2: i32) -> (i32, i32) {
    %c0_i32 = arith.constant 0 : i32
    %c0_i32_0 = arith.constant 0 : i32
    %c0_i32_1 = arith.constant 0 : i32
    return %c0_i32, %c0_i32_0 : i32, i32
  }
  func.func @transform_3(%arg0: i32, %arg1: i32, %arg2: i32) -> (i32, i32, i32) {
    %c2_i32 = arith.constant 2 : i32
    %0 = arith.muli %arg0, %c2_i32 : i32
    %1 = arith.addi %0, %arg1 : i32
    %c0_i32 = arith.constant 0 : i32
    %c0_i32_0 = arith.constant 0 : i32
    %c0_i32_1 = arith.constant 0 : i32
    return %1, %c0_i32, %c0_i32_0 : i32, i32, i32
  }
  func.func @transform_4(%arg0: i32, %arg1: i32, %arg2: i32) -> (i32, i32, i32) {
    %c2_i32 = arith.constant 2 : i32
    %0 = arith.muli %arg0, %c2_i32 : i32
    %1 = arith.addi %0, %arg1 : i32
    %c0_i32 = arith.constant 0 : i32
    %c0_i32_0 = arith.constant 0 : i32
    %c0_i32_1 = arith.constant 0 : i32
    return %1, %c0_i32, %c0_i32_0 : i32, i32, i32
  }
  func.func @transform_5(%arg0: i32, %arg1: i32, %arg2: i32) -> (i32, i32, i32) {
    %c1_i32 = arith.constant 1 : i32
    %0 = arith.muli %arg1, %c1_i32 : i32
    %1 = arith.addi %0, %arg2 : i32
    %c0_i32 = arith.constant 0 : i32
    %c0_i32_0 = arith.constant 0 : i32
    return %arg0, %c0_i32, %1 : i32, i32, i32
  }
}

</mosaic_0001>

<bundles_post_ra>
// kernel: tpu_custom_call.1
= control target key start
LH: loop header
LB: loop body
LE: loop exit
PB: predicated region body
PF: predicated region fallthrough
CT: control target
= control target key end

     0   :  { %s984_s18 = smov 0   ;;  %s986_s19 = smov 0   ;;  %s1097_s0 = inlined_call_operand.vmem [shape: f32[2,4,256], index: 0, kind: input, shape index: {}]   ;;  %s1098_s1 = inlined_call_operand.vmem [shape: f32[8,4], index: 1, kind: input, shape index: {}]   ;;  %s1099_s2 = inlined_call_operand.vmem [shape: f32[32,4], index: 2, kind: input, shape index: {}]   ;;  %s1100_s3 = inlined_call_operand.vmem [shape: f32[4,32,8], index: 3, kind: output, shape index: {0}]   ;;  %s1101_s4 = inlined_call_operand.vmem [shape: f32[4,8,1], index: 4, kind: output, shape index: {1}]   ;;  %s1102_s5 = inlined_call_operand.vmem [shape: f32[2,7,256], index: 5, kind: output, shape index: {2}]  }
   0x1   :  { %s988_s20 = smov 0   ;;  %s990_s21 = smov 0  }
   0x2   :  { %s992_s22 = smov 0  }
   0x3 LB: > { %s31_s23 = sadd.s32 1, %s942_s20  ;;  %s35_s24 = sadd.s32 1, %s946_s21  ;;  %s950_s22 = sphi %s992_s22, %s16_s22   ;;  %s946_s21 = sphi %s990_s21, %s1106_s21   ;;  %s942_s20 = sphi %s988_s20, %s1105_s20   ;;  %s938_s19 = sphi %s986_s19, %s1104_s19   ;;  %s934_s18 = sphi %s984_s18, %s1103_s18  }
   0x4   : > { %p33_p0 = scmp.ge.s32.totalorder %s31_s23, 2  ;;  %p813_p1 = scmp.ge.s32.totalorder %s950_s22, 1 }
   0x5   : > { %p232_p2 = scmp.lt.s32.totalorder %s950_s22, 5 }
   0x6   : > { %s1108_s23 = smov (%p33_p0, %s31_s23), 0  ;;  %s1110_s24 = smov (!%p33_p0, %s35_s24), %s946_s21 }
   0x7   : > { %p233_p3 = pnand %p813_p1, %p232_p2  ;;  %p37_p4 = scmp.ge.s32.totalorder %s1110_s24, 2 }
   0x8   : > { %p282_p5 = scmp.lt.s32.totalorder (!%p233_p3), %s938_s19, 1  ;;  %p284_p6 = scmp.lt.s32.totalorder (!%p233_p3), %s934_s18, 1  ;;  %v952_v0 = vmov (!%p233_p3), 0.0   ;;  %vm953_vm0 = vmmov (!%p233_p3), 0   ;;  %vm331_vm1 = vcmask (!%p233_p3), 31744   ;;  %v409_v1 = vld [vmem:[%s1099_s2] sm:$0xff] (!%p233_p3)  ;;  %v511_v7 = vlaneseq (!%p233_p3) }
   0x9   : > { %s1112_s24 = smov (%p37_p4, %s1110_s24), 0  ;;  %236 = sbr.rel (%p233_p3) target bundleno = 513 (0x201), region = 32 }
   0xa   : > { %845 = vmatprep.subr.mxu0 (!%p233_p3), %v952_v0  ;;  %847 = vmatprep.mubr.msk.f32.mxu0 (!%p233_p3), %vm953_vm0, %v952_v0  ;;  %vm335_vm2 = vcmask (!%p233_p3), 1043456   ;;  %v330_v2 = vld [vmem:[%s1098_s1] sm:$0xff] (!%p233_p3)  ;;  %v410_v4 = vld [vmem:[%s1099_s2 + $0x8] sm:$0xff] (!%p233_p3)  ;;  %v411_v5 = vld [vmem:[%s1099_s2 + $0x10] sm:$0xff] (!%p233_p3)  ;;  %s816_s25 = sshll.u32 (!%p233_p3), %s938_s19, 1  ;;  %vm327_vm3 = vcmask (!%p233_p3), 7168  }
   0xb   : > { %852 = vmatprep.mubr.msk.f32.mxu1 (!%p233_p3), %vm331_vm1, %v409_v1  ;;  %v412_v6 = vld [vmem:[%s1099_s2 + $0x18] sm:$0xff] (!%p233_p3)  ;;  %s292_s26 = sadd.s32 (!%p233_p3), %s934_s18, %s816_s25  ;;  %v512_v8 = vshrl.u32 (!%p233_p3), %v511_v7, 7  ;;  %vm322_vm5 = vcmask (!%p233_p3), 64512  }
   0xc   : > { %p293_p7 = scmp.lt.s32.totalorder (!%p233_p3), %s292_s26, 3 }
   0xd   : > { %vm513_vm4 = vcmp.lt.s32.totalorder (!%p233_p3), %v512_v8, 7 }
  0x10   : > { %s283_s27 = scalar_select %p282_p5, %s938_s19, 1 }
  0x11   : > { %s285_s28 = scalar_select %p284_p6, %s934_s18, 1 }
  0x12   : > { %s814_s29 = sshll.u32 %s283_s27, 1  ;;  %s1114_s26 = smov (!%p293_p7, %s292_s26), 3 }
  0x13   : > { %s287_s30 = sadd.s32 %s814_s29, %s285_s28  ;;  %s820_s27 = sshll.u32 %s1114_s26, 3 }
  0x14   : > { %s815_s6 = sshll.u32 %s287_s30, 2  ;;  %s822_s7 = sshll.u32 %s287_s30, 3 }
  0x15   : > { %s289_s9 = scalar_lea.vmem %s1097_s0, %s815_s6  ;;  %s1055_s6 = scalar_lea.vmem %s1101_s4, %s820_s27 }
  0x16   : > { %v329_v3 = vld [vmem:[%s289_s9] sm:$0xf]  ;;  %328 = vst.msk [vmem:[%s1055_s6] sm:$0xff] %vm327_vm3, %v952_v0  ;;  %s316_s8 = scalar_lea.vmem %s1102_s5, %s822_s7  ;;  %s832_s30 = sshll.u32 %s1114_s26, 5 }
  0x17   : > { %846 = vmatpush3.msk.msra.mxu0 %vm335_vm2, %v329_v3  ;;  %850 = vmatprep.subr.msk.mxu1 %vm335_vm2, %v329_v3  ;;  %s297_s11 = scalar_lea.vmem %s1100_s3, %s832_s30 }
  0x18   : > { %848 = vmatmul.mubr.msk.f32.vlgmr.msra.gmra.mrb[0].mxu0 %vm331_vm1, %v330_v2  ;;  %851 = vmatpush3.msk.msra.mxu1 %vm335_vm2, %v329_v3  ;;  %324 = vst.msk [vmem:[%s297_s11 + $0x8] sm:$0xff] %vm322_vm5, %v952_v0  ;;  %323 = vst.msk [vmem:[%s297_s11] sm:$0xff] %vm322_vm5, %v952_v0 }
  0x19   : > { %853 = vmatmul.mubr.msk.f32.vlgmr.msra.gmra.mrb[0].mxu1 %vm331_vm1, %v410_v4  ;;  %325 = vst.msk [vmem:[%s297_s11 + $0x10] sm:$0xff] %vm322_vm5, %v952_v0  ;;  %326 = vst.msk [vmem:[%s297_s11 + $0x18] sm:$0xff] %vm322_vm5, %v952_v0 }
  0x1a   : > { %855 = vmatprep.mubr.msk.f32.mxu1 %vm331_vm1, %v411_v5 }
  0x1d   : > { %856 = vmatmul.mubr.msk.f32.gmra.mrb[2].mxu1 %vm331_vm1, %v412_v6  ;;  %v532_v33 = vld [vmem:[%s1055_s6] sm:$0xff] }
  0x1f   : > { %v539_v36 = vld [vmem:[%s297_s11 + $0x8] sm:$0xff]  ;;  %v538_v37 = vld [vmem:[%s297_s11] sm:$0xff] }
  0x20   : > { %v541_v42 = vld [vmem:[%s297_s11 + $0x18] sm:$0xff]  ;;  %v540_v43 = vld [vmem:[%s297_s11 + $0x10] sm:$0xff] }
  0xeb   : > { %v405_v9 = vpop.f32.mrb[0].mxu0 }
  0xec   : > { %510 = vst [vmem:[%s316_s8] sm:$0x7f] %v405_v9  ;;  %v514_v10 = vsel %vm513_vm4, %v405_v9, -1e+30  ;;  %v849_v11 = vpop.f32.mrb[1].mxu0  ;;  %v854_v12 = vpop.f32.mrb[0].mxu1 }
  0xed   : > { %v515_v13 = vrot.slane %v514_v10, 4  ;;  %v491_v14 = vpop.f32.mrb[1].mxu1 }
  0xee   : > { %860 = vmatprep.mubr.f32.mxu0 %v491_v14 }
  0xef   : > { %v516_v15 = vmax.f32 %v514_v10, %v515_v13 }
  0xf0   : > { %v857_v16 = vpop.f32.mrb[2].mxu1 }
  0xf1   : > { %v517_v17 = vrot.slane %v516_v15, 2  ;;  %v501_v18 = vpop.f32.mrb[3].mxu1 }
  0xf3   : > { %v518_v19 = vmax.f32 %v516_v15, %v517_v17 }
  0xf5   : > { %v519_v20 = vrot.slane %v518_v19, 1 }
  0xf7   : > { %v520_v21 = vmax.f32 %v518_v19, %v519_v20 }
  0xf9   : > { %v521_v22 = vsub.f32 %v514_v10, %v520_v21 }
  0xfb   : > { %v522_v23 = vmul.f32 1.442695, %v521_v22 }
  0xfd   : > { %908 = vpow2.f32 %v522_v23 }
 0x107   : > { %v909_v24 = vpop.eup %908 }
 0x108   : > { %v524_v25 = vrot.slane %v909_v24, 4 }
 0x10a   : > { %v525_v26 = vadd.f32 %v909_v24, %v524_v25 }
 0x10c   : > { %v526_v27 = vrot.slane %v525_v26, 2 }
 0x10e   : > { %v527_v28 = vadd.f32 %v526_v27, %v525_v26 }
 0x110   : > { %v528_v29 = vrot.slane %v527_v28, 1 }
 0x112   : > { %v529_v30 = vadd.f32 %v528_v29, %v527_v28 }
 0x114   : > { %910 = vrcp.f32 %v529_v30 }
 0x11e   : > { %v911_v31 = vpop.eup %910 }
 0x11f   : > { %v531_v32 = vmul.f32 %v911_v31, %v909_v24 }
 0x121   : > { %533 = vadd.xlane.f32.xlu0 %v531_v32  ;;  %858 = vmatprep.subr.mxu0 %v531_v32 }
 0x122   : > { %859 = vmatpush3.xpose.msra.mxu0 %v531_v32 }
 0x125   : > { %861 = vmatmul.mubr.f32.vlgmr.msra.gmra.mrb[2].mxu0 %v854_v12 }
 0x126   : > { %863 = vmatprep.mubr.f32.mxu0 %v501_v18 }
 0x129   : > { %864 = vmatmul.mubr.f32.gmra.mrb[4].mxu0 %v857_v16 }
 0x1ae   : > { %v534_v34 = vpop.xlane.xlu0 %533 }
 0x1af   : > { %v535_v35 = vadd.f32 %v534_v34, %v532_v33 }
 0x1b1   : > { %537 = vst.msk [vmem:[%s1055_s6] sm:$0xff] %vm327_vm3, %v535_v35 }
 0x1f8   : > { %v862_v38 = vpop.f32.mrb[2].mxu0 }
 0x1f9   : > { %v628_v39 = vadd.f32 %v862_v38, %v539_v36  ;;  %v608_v40 = vpop.f32.mrb[3].mxu0 }
 0x1fa   : > { %v627_v41 = vadd.f32 %v608_v40, %v538_v37 }
 0x1fb   : > { %633 = vst.msk [vmem:[%s297_s11 + $0x8] sm:$0xff] %vm322_vm5, %v628_v39 }
 0x1fc   : > { %632 = vst.msk [vmem:[%s297_s11] sm:$0xff] %vm322_vm5, %v627_v41  ;;  %v865_v44 = vpop.f32.mrb[4].mxu0 }
 0x1fd   : > { %v630_v45 = vadd.f32 %v865_v44, %v541_v42  ;;  %v618_v46 = vpop.f32.mrb[5].mxu0 }
 0x1fe   : > { %v629_v47 = vadd.f32 %v618_v46, %v540_v43 }
 0x1ff   : > { %635 = vst.msk [vmem:[%s297_s11 + $0x18] sm:$0xff] %vm322_vm5, %v630_v45 }
 0x200   : > { %634 = vst.msk [vmem:[%s297_s11 + $0x10] sm:$0xff] %vm322_vm5, %v629_v47 }
 0x201 PF: > { %s16_s22 = sadd.s32 1, %s950_s22   ;;  %s1103_s18 = smov %s942_s20 }
 0x202   : > { %p13_p8 = scmp.ge.s32.totalorder %s16_s22, 6   ;;  %s1104_s19 = smov %s946_s21 }
 0x203   : > { %s1105_s20 = smov %s1108_s23  ;;  %s1106_s21 = smov %s1112_s24 }
 0x204   :  { %15 = sbr.rel (!%p13_p8) target bundleno = 3 (0x3), region = 90 }

</bundles_post_ra>
